<compile_context>
chip_gen: v5e
topology: v5e:2x2
jax: 0.10.0
libtpu: 0.0.40
codegen_flags: <defaults>
</compile_context>

<pallas_src>
import functools

import jax
import jax.numpy as jnp
from jax.experimental import pallas as pl
from jax.experimental.pallas import tpu as pltpu


def _round_up(n, m):
    return ((n + m - 1) // m) * m


def _poly_kernel(x_ref, w_ref, b_ref, o_ref, *, degree, x_dim, y_dim):
    # x_ref: (x_dim, TILE_B)  VMEM   -- batch on the lane axis
    # w_ref: (degree*x_dim*y_dim,) SMEM, layout idx = (p*x_dim + j)*y_dim + o
    # b_ref: (y_dim,)          SMEM  -- fc.bias + (bias_w*1 + bias_b) pre-fused
    # o_ref: (y_dim, TILE_B)   VMEM
    tile_b = x_ref.shape[1]

    # Start each output channel at its (fused) bias.
    acc = [jnp.zeros((1, tile_b), jnp.float32) + b_ref[o] for o in range(y_dim)]

    # y[o, b] = b_eff[o] + sum_{j, p} w[p, j, o] * x[j, b]^(p+1)
    # Tiny static trip counts (x_dim=3, degree=3, y_dim=1) -> fully unrolled VPU MACs.
    for j in range(x_dim):
        xj = x_ref[j:j + 1, :]              # (1, TILE_B), lane-dense load
        xp = xj
        for p in range(degree):
            if p > 0:
                xp = xp * xj                # x_j ** (p+1), built incrementally (VPU)
            for o in range(y_dim):
                w = w_ref[(p * x_dim + j) * y_dim + o]   # SMEM scalar
                acc[o] = acc[o] + w * xp                 # scalar-broadcast MAC (VPU)

    out = acc[0] if y_dim == 1 else jnp.concatenate(acc, axis=0)
    o_ref[...] = out.astype(o_ref.dtype)


def poly_regression(x, fc_w, fc_b, bias_w, bias_b, degree, *, tile_b=2048):
    """x: (B, x_dim); fc_w: (y_dim, x_dim*degree); fc_b: (y_dim,);
       bias_w: (1, 1); bias_b: (1,).  Returns (B, y_dim) float32."""
    B, x_dim = x.shape
    y_dim = fc_w.shape[0]
    assert fc_w.shape[1] == x_dim * degree

    # Batch tile: multiple of 128 (lane width); sized well under v7x's VMEM budget
    # (2 bufs * (x_dim + y_dim) * tile_b * 4 B is only tens of KiB at these widths).
    tile_b = min(tile_b, _round_up(B, 128))
    b_pad = _round_up(B, tile_b)
    grid = (b_pad // tile_b,)

    # Lane-dense input: (x_dim, B_pad) with batch on the 128-lane axis, zero-padded tail.
    xt = jnp.zeros((x_dim, b_pad), jnp.float32).at[:, :B].set(x.astype(jnp.float32).T)

    # PyTorch flattening order: column j*degree + (power-1).
    # Re-order to flat SMEM layout (p, j, o): idx = (p*x_dim + j)*y_dim + o.
    w_flat = jnp.transpose(
        fc_w.reshape(y_dim, x_dim, degree).astype(jnp.float32), (2, 1, 0)
    ).reshape(-1)

    # Fused bias: fc.bias + self.bias(Tensor([1])) = fc.bias + (bias_w*1 + bias_b)  (scalar).
    extra = (bias_w.reshape(()) * 1.0 + bias_b.reshape(())).astype(jnp.float32)
    b_eff = fc_b.astype(jnp.float32).reshape(y_dim) + extra

    kernel = functools.partial(_poly_kernel, degree=degree, x_dim=x_dim, y_dim=y_dim)
    smem = pl.BlockSpec(memory_space=pltpu.MemorySpace.SMEM)

    out_t = pl.pallas_call(
        kernel,
        out_shape=jax.ShapeDtypeStruct((y_dim, b_pad), jnp.float32),
        grid=grid,
        in_specs=[
            pl.BlockSpec((x_dim, tile_b), lambda i: (0, i)),   # batch-tiled, pipelined
            smem,                                              # weights: SMEM, resident
            smem,                                              # fused bias: SMEM, resident
        ],
        out_specs=pl.BlockSpec((y_dim, tile_b), lambda i: (0, i)),
        compiler_params=pltpu.CompilerParams(
            dimension_semantics=("parallel",),                 # megacore split on v7x
        ),
    )(xt, w_flat, b_eff)

    # Back to PyTorch layout, drop batch padding.
    return out_t.T[:B]


def poly_regression_ref(x, fc_w, fc_b, bias_w, bias_b, degree):
    """Pure-JAX reference mirroring the PyTorch forward exactly."""
    B, x_dim = x.shape
    xe = x[:, :, None]                                                       # (B, x_dim, 1)
    feats = jnp.concatenate([xe ** i for i in range(1, degree + 1)], axis=2)  # (B, x_dim, degree)
    flat = feats.reshape(B, x_dim * degree)
    y = flat @ fc_w.T + fc_b                                                 # nn.Linear
    y = y + (jnp.array([1.0], jnp.float32) @ bias_w.T + bias_b)              # self.bias(Tensor([1]))
    return y


if __name__ == "__main__":
    # Demo-implied shapes: x = [[1,2,3],[4,5,6]] -> B=2, x_dim=3, degree=3, y_dim=1
    B, x_dim, degree, y_dim = 2, 3, 3, 1

    key = jax.random.PRNGKey(0)
    kx, kw, kb, kbw, kbb, kx2 = jax.random.split(key, 6)

    x = jax.random.normal(kx, (B, x_dim), dtype=jnp.float32)
    fc_w = jax.random.normal(kw, (y_dim, x_dim * degree), dtype=jnp.float32) * 0.1
    fc_b = jax.random.normal(kb, (y_dim,), dtype=jnp.float32) * 0.1
    bias_w = jax.random.normal(kbw, (1, 1), dtype=jnp.float32) * 0.1
    bias_b = jax.random.normal(kbb, (1,), dtype=jnp.float32) * 0.1

    y = jax.block_until_ready(poly_regression(x, fc_w, fc_b, bias_w, bias_b, degree))
    y_ref = poly_regression_ref(x, fc_w, fc_b, bias_w, bias_b, degree)
    assert y.shape == (B, y_dim)
    assert jnp.allclose(y, y_ref, atol=1e-5, rtol=1e-5), (y, y_ref)

    # Larger batch: exercises a multi-tile grid (3 tiles) with a padded tail (300 % 128 != 0).
    B2 = 300
    x2 = jax.random.normal(kx2, (B2, x_dim), dtype=jnp.float32)
    y2 = jax.block_until_ready(
        poly_regression(x2, fc_w, fc_b, bias_w, bias_b, degree, tile_b=128)
    )
    y2_ref = poly_regression_ref(x2, fc_w, fc_b, bias_w, bias_b, degree)
    assert y2.shape == (B2, y_dim)
    assert jnp.allclose(y2, y2_ref, atol=1e-4, rtol=1e-4)

    print("KERNEL_OK")
</pallas_src>

<mosaic_0001>
module attributes {stable_mosaic.version = 11 : i64} {
  func.func @_poly_kernel(%arg0: i32, %arg1: memref<3x128xf32, #tpu.memory_space<vmem>>, %arg2: memref<9xf32, #tpu.memory_space<smem>>, %arg3: memref<1xf32, #tpu.memory_space<smem>>, %arg4: memref<1x128xf32, #tpu.memory_space<vmem>>) attributes {dimension_semantics = [#tpu.dimension_semantics<parallel>], iteration_bounds = array<i64: 1>, scalar_prefetch = 0 : i64, scratch_operands = 0 : i64, tpu.core_type = #tpu.core_type<tc>, window_params = [{transform_indices = @transform_0, window_bounds = array<i64: 3, 128>}, {transform_indices = @transform_1, window_bounds = array<i64: 9>}, {transform_indices = @transform_2, window_bounds = array<i64: 1>}, {transform_indices = @transform_3, window_bounds = array<i64: 1, 128>}]} {
    %cst = arith.constant 0.000000e+00 : f32
    %0 = vector.broadcast %cst : f32 to vector<1x128xf32>
    %c0 = arith.constant 0 : index
    %1 = memref.load %arg3[%c0] : memref<1xf32, #tpu.memory_space<smem>>
    %2 = vector.broadcast %1 : f32 to vector<1x128xf32>
    %3 = arith.addf %0, %2 : vector<1x128xf32>
    %c0_0 = arith.constant 0 : index
    %c0_1 = arith.constant 0 : index
    %4 = vector.load %arg1[%c0_0, %c0_1] : memref<3x128xf32, #tpu.memory_space<vmem>>, vector<1x128xf32>
    %c0_2 = arith.constant 0 : index
    %5 = memref.load %arg2[%c0_2] : memref<9xf32, #tpu.memory_space<smem>>
    %6 = vector.broadcast %5 : f32 to vector<1x128xf32>
    %7 = arith.mulf %6, %4 : vector<1x128xf32>
    %8 = arith.addf %3, %7 : vector<1x128xf32>
    %9 = arith.mulf %4, %4 : vector<1x128xf32>
    %c3 = arith.constant 3 : index
    %10 = memref.load %arg2[%c3] : memref<9xf32, #tpu.memory_space<smem>>
    %11 = vector.broadcast %10 : f32 to vector<1x128xf32>
    %12 = arith.mulf %11, %9 : vector<1x128xf32>
    %13 = arith.addf %8, %12 : vector<1x128xf32>
    %14 = arith.mulf %9, %4 : vector<1x128xf32>
    %c6 = arith.constant 6 : index
    %15 = memref.load %arg2[%c6] : memref<9xf32, #tpu.memory_space<smem>>
    %16 = vector.broadcast %15 : f32 to vector<1x128xf32>
    %17 = arith.mulf %16, %14 : vector<1x128xf32>
    %18 = arith.addf %13, %17 : vector<1x128xf32>
    %c1 = arith.constant 1 : index
    %c0_3 = arith.constant 0 : index
    %19 = vector.load %arg1[%c1, %c0_3] : memref<3x128xf32, #tpu.memory_space<vmem>>, vector<1x128xf32>
    %c1_4 = arith.constant 1 : index
    %20 = memref.load %arg2[%c1_4] : memref<9xf32, #tpu.memory_space<smem>>
    %21 = vector.broadcast %20 : f32 to vector<1x128xf32>
    %22 = arith.mulf %21, %19 : vector<1x128xf32>
    %23 = arith.addf %18, %22 : vector<1x128xf32>
    %24 = arith.mulf %19, %19 : vector<1x128xf32>
    %c4 = arith.constant 4 : index
    %25 = memref.load %arg2[%c4] : memref<9xf32, #tpu.memory_space<smem>>
    %26 = vector.broadcast %25 : f32 to vector<1x128xf32>
    %27 = arith.mulf %26, %24 : vector<1x128xf32>
    %28 = arith.addf %23, %27 : vector<1x128xf32>
    %29 = arith.mulf %24, %19 : vector<1x128xf32>
    %c7 = arith.constant 7 : index
    %30 = memref.load %arg2[%c7] : memref<9xf32, #tpu.memory_space<smem>>
    %31 = vector.broadcast %30 : f32 to vector<1x128xf32>
    %32 = arith.mulf %31, %29 : vector<1x128xf32>
    %33 = arith.addf %28, %32 : vector<1x128xf32>
    %c2 = arith.constant 2 : index
    %c0_5 = arith.constant 0 : index
    %34 = vector.load %arg1[%c2, %c0_5] : memref<3x128xf32, #tpu.memory_space<vmem>>, vector<1x128xf32>
    %c2_6 = arith.constant 2 : index
    %35 = memref.load %arg2[%c2_6] : memref<9xf32, #tpu.memory_space<smem>>
    %36 = vector.broadcast %35 : f32 to vector<1x128xf32>
    %37 = arith.mulf %36, %34 : vector<1x128xf32>
    %38 = arith.addf %33, %37 : vector<1x128xf32>
    %39 = arith.mulf %34, %34 : vector<1x128xf32>
    %c5 = arith.constant 5 : index
    %40 = memref.load %arg2[%c5] : memref<9xf32, #tpu.memory_space<smem>>
    %41 = vector.broadcast %40 : f32 to vector<1x128xf32>
    %42 = arith.mulf %41, %39 : vector<1x128xf32>
    %43 = arith.addf %38, %42 : vector<1x128xf32>
    %44 = arith.mulf %39, %34 : vector<1x128xf32>
    %c8 = arith.constant 8 : index
    %45 = memref.load %arg2[%c8] : memref<9xf32, #tpu.memory_space<smem>>
    %46 = vector.broadcast %45 : f32 to vector<1x128xf32>
    %47 = arith.mulf %46, %44 : vector<1x128xf32>
    %48 = arith.addf %43, %47 : vector<1x128xf32>
    %c0_7 = arith.constant 0 : index
    %c0_8 = arith.constant 0 : index
    %49 = vector.load %arg4[%c0_7, %c0_8] : memref<1x128xf32, #tpu.memory_space<vmem>>, vector<1x128xf32>
    tpu.vector_store %arg4[%c0_7, %c0_8], %48 {strides = array<i32>} : memref<1x128xf32, #tpu.memory_space<vmem>>, vector<1x128xf32>,
    return
  }
  func.func @transform_0(%arg0: i32) -> (i32, i32) {
    %c0_i32 = arith.constant 0 : i32
    %c0_i32_0 = arith.constant 0 : i32
    return %c0_i32, %arg0 : i32, i32
  }
  func.func @transform_1(%arg0: i32) -> i32 {
    %c0_i32 = arith.constant 0 : i32
    %c0_i32_0 = arith.constant 0 : i32
    return %c0_i32 : i32
  }
  func.func @transform_2(%arg0: i32) -> i32 {
    %c0_i32 = arith.constant 0 : i32
    %c0_i32_0 = arith.constant 0 : i32
    return %c0_i32 : i32
  }
  func.func @transform_3(%arg0: i32) -> (i32, i32) {
    %c0_i32 = arith.constant 0 : i32
    %c0_i32_0 = arith.constant 0 : i32
    return %c0_i32, %arg0 : i32, i32
  }
}

</mosaic_0001>

<bundles_post_ra>
// kernel: tpu_custom_call.1
= control target key start
LH: loop header
LB: loop body
LE: loop exit
PB: predicated region body
PF: predicated region fallthrough
CT: control target
= control target key end

     0   :  { %9 = vsyncpa [#allocation4], 0  ;;  %s222_s0 = inlined_call_operand.hbm [shape: f32[3,128], index: 0, kind: input, shape index: {}]   ;;  %s223_s1 = inlined_call_operand.vmem [shape: f32[9], index: 1, kind: input, shape index: {}]   ;;  %s224_s2 = inlined_call_operand.<no memory space> [shape: f32[1], index: 2, kind: input, shape index: {}]   ;;  %s225_s3 = inlined_call_operand.hbm [shape: f32[1,128], index: 3, kind: output, shape index: {}]  }
   0x1   :  { %10 = vsyncpa [#allocation6], 0 }
   0x2   :  { %11 = vsyncpa [#allocation5], 0  ;;  %s17_s14 = sshll.u32 %s222_s0, 4  ;;  %s187_s15 = smov [#allocation3]   ;;  %s18_s14 = int_to_ptr.hbm [resolvable:$true] %s17_s14 }
   0x3   :  { %s19_s16 = sshll.u32 %s187_s15, 4  ;;  %s28_s19 = sshll.u32 %s223_s1, 4  ;;  %s20_s16 = int_to_ptr.vmem [resolvable:$true] %s19_s16  ;;  %s29_s19 = int_to_ptr.vmem [resolvable:$true] %s28_s19 }
   0x4   :  { %22 = dma.hbm_to_vmem [thread:$0]  %s18_s14, 64, %s20_s16, [#allocation4]  }
   0x5   :  { %s188_s20 = smov [#allocation7]  }
   0x6   :  { %31 = dma.vmem_to_smem %s29_s19, 16, %s188_s20, [#allocation6]  }
   0x7   :  { %181 = dma.done.wait [#allocation4], 64  }
   0x8   :  { %182 = vsyncadd [#allocation4], 4294967232 }
   0x9   :  { %183 = dma.done.wait [#allocation6], 16  }
   0xa   :  { %184 = vsyncadd [#allocation6], 4294967280 }
   0xb   :  { %42 = sfence }
   0xc   :  { %v46_v0 = vld [vmem:[#allocation3] sm:$0x1]  ;;  %s47_s21 = sld [smem:[#allocation7]]  ;;  %v61_v2 = vld [vmem:[#allocation3 + $0x1] sm:$0x1]  ;;  %v44_v4 = vstv %s224_s2  ;;  %s189_s2 = smov [#allocation8]  }
   0xd   :  { %v51_v1 = vmul.f32 %v46_v0, %v46_v0  ;;  %s110_s0 = sld [smem:[#allocation7 + $0x3]]  ;;  %v66_v8 = vmul.f32 %v61_v2, %v61_v2  ;;  %v76_v15 = vld [vmem:[#allocation3 + $0x2] sm:$0x1]  ;;  %s97_s30 = sshll.u32 %s189_s2, 4  ;;  %s98_s30 = int_to_ptr.vmem [resolvable:$true] %s97_s30 }
   0xe   :  { %s111_s22 = sld [smem:[#allocation7 + $0x6]]  ;;  %v81_v22 = vmul.f32 %v76_v15, %v76_v15  ;;  %s99_s6 = sshll.u32 %s225_s3, 4  ;;  %s100_s6 = int_to_ptr.hbm [resolvable:$true] %s99_s6 }
   0xf   :  { %s112_s23 = sld [smem:[#allocation7 + $0x1]]  ;;  %v56_v3 = vmul.f32 %v51_v1, %v46_v0  ;;  %v71_v18 = vmul.f32 %v66_v8, %v61_v2 }
  0x10   :  { %s113_s24 = sld [smem:[#allocation7 + $0x4]]  ;;  %v86_v29 = vmul.f32 %v81_v22, %v76_v15 }
  0x11   :  { %s114_s25 = sld [smem:[#allocation7 + $0x7]] }
  0x12   :  { %v48_v5 = vstv %s47_s21  ;;  %s115_s27 = sld [smem:[#allocation7 + $0x2]] }
  0x13   :  { %v49_v6 = vmul.f32 %v48_v5, %v46_v0  ;;  %v53_v7 = vstv %s110_s0  ;;  %s116_s28 = sld [smem:[#allocation7 + $0x5]] }
  0x14   :  { %v54_v9 = vmul.f32 %v53_v7, %v51_v1  ;;  %v58_v10 = vstv %s111_s22  ;;  %s117_s29 = sld [smem:[#allocation7 + $0x8]] }
  0x15   :  { %v50_v11 = vadd.f32 %v49_v6, %v44_v4  ;;  %v59_v12 = vmul.f32 %v58_v10, %v56_v3  ;;  %v63_v13 = vstv %s112_s23 }
  0x16   :  { %v68_v14 = vstv %s113_s24  ;;  %v64_v17 = vmul.f32 %v63_v13, %v61_v2 }
  0x17   :  { %v55_v16 = vadd.f32 %v54_v9, %v50_v11  ;;  %v73_v19 = vstv %s114_s25  ;;  %v69_v21 = vmul.f32 %v68_v14, %v66_v8 }
  0x18   :  { %v78_v23 = vstv %s115_s27  ;;  %v74_v25 = vmul.f32 %v73_v19, %v71_v18 }
  0x19   :  { %v60_v20 = vadd.f32 %v59_v12, %v55_v16  ;;  %v83_v26 = vstv %s116_s28  ;;  %v79_v28 = vmul.f32 %v78_v23, %v76_v15 }
  0x1a   :  { %v88_v30 = vstv %s117_s29  ;;  %v84_v32 = vmul.f32 %v83_v26, %v81_v22 }
  0x1b   :  { %v65_v24 = vadd.f32 %v64_v17, %v60_v20  ;;  %v89_v34 = vmul.f32 %v88_v30, %v86_v29 }
  0x1d   :  { %v70_v27 = vadd.f32 %v69_v21, %v65_v24 }
  0x1f   :  { %v75_v31 = vadd.f32 %v74_v25, %v70_v27 }
  0x21   :  { %v80_v33 = vadd.f32 %v79_v28, %v75_v31 }
  0x23   :  { %v85_v35 = vadd.f32 %v84_v32, %v80_v33 }
  0x25   :  { %v90_v36 = vadd.f32 %v89_v34, %v85_v35 }
  0x27   :  { %91 = vst [vmem:[#allocation8] sm:$0x1] %v90_v36 }
  0x28   :  { %102 = dma.vmem_to_hbm [thread:$0]  %s98_s30, 16, %s100_s6, [#allocation5]  }
  0x29   :  { %185 = dma.done.wait [#allocation5], 16  }
  0x2a   :  { %186 = vsyncadd [#allocation5], 4294967280 }
  0x2b   :  { %107 = vsyncpa [#allocation4], 1 }
  0x2c   :  { %108 = vsyncpa [#allocation5], 1 }
  0x2d   :  { %109 = vsyncpa [#allocation6], 1 }

</bundles_post_ra>
